<compile_context>
chip_gen: v5e
topology: v5e:2x2
jax: 0.10.0
libtpu: 0.0.40
codegen_flags: <defaults>
</compile_context>

<pallas_src>
import jax
import jax.numpy as jnp
from jax.experimental import pallas as pl
from jax.experimental.pallas import tpu as pltpu

_LANE = 128
_F32_SUBLANE = 8


def sind_kernel(x_ref, o_ref):
    x = x_ref[...]
    # multiply by 0.2 instead of dividing by 5 (cheaper on the VPU; <=1 ulp off 1/5).
    # TODO(synk): on v7x, if the VPU sin polynomial binds before HBM, swap in a
    # shorter minimax polynomial (output is scaled by 0.2, so accuracy headroom exists).
    o_ref[...] = jnp.sin(10.0 * x) * 0.2 + x


def _ceil_div(a, b):
    return -(-a // b)


def _sublane_multiple(dtype):
    # Native sublane packing: f32 -> 8, bf16/f16 -> 16, int8/fp8 -> 32.
    itemsize = max(jnp.dtype(dtype).itemsize, 1)
    return max(_F32_SUBLANE, 32 // itemsize)


def _pick_layout(n, sub):
    """Lane-dense (rows, cols): cols a 128-multiple with n % cols == 0.

    Prefers a factorization whose row count is a multiple of the sublane
    granularity (no masked last block), but any n % cols == 0 is acceptable —
    only the BLOCK shape must be (8,128)-divisible, not the array shape.
    """
    best = None
    for cols in (1024, 512, 256, _LANE):
        if n % cols == 0:
            rows = n // cols
            if rows % sub == 0:
                return rows, cols
            if best is None:
                best = (rows, cols)
    return best


def _tpu_config():
    """Pick block-size / VMEM-limit defaults per TPU generation."""
    vmem_bytes = None
    try:
        info = pltpu.get_tpu_info()
        vmem_bytes = getattr(info, "vmem_capacity_bytes", None)
    except Exception:
        vmem_bytes = None
    if vmem_bytes is not None and vmem_bytes >= (100 << 20):
        # v5e / v6e: 128 MiB physical VMEM, single TensorCore -> big blocks.
        return dict(target_block_bytes=16 << 20, vmem_limit_bytes=80 << 20,
                    force_multi_block=False)
    # v7x-like (64 MiB VMEM, 2 TCs) or unknown: conservative blocks, even grid.
    return dict(target_block_bytes=8 << 20, vmem_limit_bytes=48 << 20,
                force_multi_block=True)


def _sind_2d(x2d, *, target_block_bytes, vmem_limit_bytes, force_multi_block):
    rows, cols = x2d.shape
    dtype = x2d.dtype
    sub = _sublane_multiple(dtype)
    row_bytes = cols * dtype.itemsize

    # Block row count: a multiple of the sublane granularity, or exactly `rows`
    # (full-extent blocks are legal for any row count).
    tile_r = max(sub, (target_block_bytes // row_bytes) // sub * sub)
    if tile_r >= rows:
        tile_r = rows
        if force_multi_block:
            # v7x has 2 TensorCores: a single grid step leaves one core idle.
            # Split into >=2 legal blocks when possible.
            split = _ceil_div(_ceil_div(rows, 2), sub) * sub
            if split < rows:
                tile_r = split

    grid = (_ceil_div(rows, tile_r),)
    n_elems = rows * cols
    cost = pl.CostEstimate(
        flops=3 * n_elems,
        transcendentals=n_elems,
        bytes_accessed=2 * n_elems * dtype.itemsize,
    )

    return pl.pallas_call(
        sind_kernel,
        out_shape=jax.ShapeDtypeStruct((rows, cols), dtype),
        grid_spec=pltpu.PrefetchScalarGridSpec(
            num_scalar_prefetch=0,
            grid=grid,
            in_specs=[pl.BlockSpec((tile_r, cols), lambda i: (i, 0))],
            out_specs=pl.BlockSpec((tile_r, cols), lambda i: (i, 0)),
        ),
        compiler_params=pltpu.CompilerParams(
            dimension_semantics=("parallel",),
            vmem_limit_bytes=vmem_limit_bytes,
        ),
        cost_estimate=cost,
    )(x2d)


def sind(x, *, target_block_bytes=None):
    """Elementwise sin(10*x)/5 + x via a tiled Pallas TPU kernel."""
    orig_shape = x.shape
    dtype = x.dtype
    n = x.size
    if n == 0:
        return x

    cfg = _tpu_config()
    if target_block_bytes is not None:
        cfg["target_block_bytes"] = target_block_bytes

    flat = x.reshape(-1)
    sub = _sublane_multiple(dtype)

    if n % _LANE == 0:
        # Fast path: pure metadata reshape, no padding copy even when rows % 8 != 0.
        rows, cols = _pick_layout(n, sub)
        out2d = _sind_2d(flat.reshape(rows, cols), **cfg)
        return out2d.reshape(orig_shape)

    # Unaligned size: Pallas over the 128-aligned prefix, plain jnp on the <128
    # element tail (avoids pad + output-slice extra HBM passes).
    m = (n // _LANE) * _LANE
    tail = flat[m:]
    tail_out = (jnp.sin(10.0 * tail) * 0.2 + tail).astype(dtype)
    if m == 0:
        return tail_out.reshape(orig_shape)
    rows, cols = _pick_layout(m, sub)
    head_out = _sind_2d(flat[:m].reshape(rows, cols), **cfg).reshape(-1)
    return jnp.concatenate([head_out, tail_out]).reshape(orig_shape)


def sind_ref(x):
    return jnp.sin(10.0 * x) / 5.0 + x


if __name__ == "__main__":
    key = jax.random.PRNGKey(0)

    # Typical NCHW activation (fast path: zero-copy metadata reshape).
    x = jax.random.normal(key, (2, 4, 16, 16), dtype=jnp.float32)
    out = sind(x)
    jax.block_until_ready(out)
    ref = sind_ref(x)
    assert out.shape == x.shape
    assert out.dtype == x.dtype
    assert jnp.allclose(out, ref, atol=1e-5, rtol=1e-5)

    # 128-divisible but rows not a multiple of 8: relaxed layout + masked
    # partial last block (small block size forces a multi-step grid).
    x2 = jax.random.normal(jax.random.PRNGKey(1), (27, 128), dtype=jnp.float32)
    out2 = sind(x2, target_block_bytes=8 * 128 * 4)
    jax.block_until_ready(out2)
    assert out2.shape == x2.shape
    assert jnp.allclose(out2, sind_ref(x2), atol=1e-5, rtol=1e-5)

    # Non-128-divisible size: Pallas prefix + jnp tail path.
    x3 = jax.random.normal(jax.random.PRNGKey(2), (3, 50), dtype=jnp.float32)
    out3 = sind(x3)
    jax.block_until_ready(out3)
    assert out3.shape == x3.shape
    assert jnp.allclose(out3, sind_ref(x3), atol=1e-5, rtol=1e-5)

    print("KERNEL_OK")
</pallas_src>

<mosaic_0001>
module attributes {stable_mosaic.version = 11 : i64} {
  func.func @sind_kernel(%arg0: i32, %arg1: memref<8x256xf32, #tpu.memory_space<vmem>>, %arg2: memref<8x256xf32, #tpu.memory_space<vmem>>) attributes {dimension_semantics = [#tpu.dimension_semantics<parallel>], iteration_bounds = array<i64: 1>, scalar_prefetch = 0 : i64, scratch_operands = 0 : i64, tpu.core_type = #tpu.core_type<tc>, window_params = [{transform_indices = @transform_0, window_bounds = array<i64: 8, 256>}, {transform_indices = @transform_1, window_bounds = array<i64: 8, 256>}]} {
    %c0 = arith.constant 0 : index
    %c0_0 = arith.constant 0 : index
    %0 = vector.load %arg1[%c0, %c0_0] : memref<8x256xf32, #tpu.memory_space<vmem>>, vector<8x256xf32>
    %cst = arith.constant 1.000000e+01 : f32
    %1 = vector.broadcast %cst : f32 to vector<8x256xf32>
    %2 = arith.mulf %1, %0 : vector<8x256xf32>
    %3 = math.sin %2 : vector<8x256xf32>
    %cst_1 = arith.constant 2.000000e-01 : f32
    %4 = vector.broadcast %cst_1 : f32 to vector<8x256xf32>
    %5 = arith.mulf %3, %4 : vector<8x256xf32>
    %6 = arith.addf %5, %0 : vector<8x256xf32>
    %c0_2 = arith.constant 0 : index
    %c0_3 = arith.constant 0 : index
    %7 = vector.load %arg2[%c0_2, %c0_3] : memref<8x256xf32, #tpu.memory_space<vmem>>, vector<8x256xf32>
    tpu.vector_store %arg2[%c0_2, %c0_3], %6 {strides = array<i32>} : memref<8x256xf32, #tpu.memory_space<vmem>>, vector<8x256xf32>,
    return
  }
  func.func @transform_0(%arg0: i32) -> (i32, i32) {
    %c0_i32 = arith.constant 0 : i32
    %c0_i32_0 = arith.constant 0 : i32
    return %arg0, %c0_i32 : i32, i32
  }
  func.func @transform_1(%arg0: i32) -> (i32, i32) {
    %c0_i32 = arith.constant 0 : i32
    %c0_i32_0 = arith.constant 0 : i32
    return %arg0, %c0_i32 : i32, i32
  }
}

</mosaic_0001>

<bundles_post_ra>
// kernel: tpu_custom_call.1
= control target key start
LH: loop header
LB: loop body
LE: loop exit
PB: predicated region body
PF: predicated region fallthrough
CT: control target
= control target key end

     0   :  { %6 = vsyncpa [#allocation3], 0  ;;  %s633_s0 = inlined_call_operand.hbm [shape: f32[8,256], index: 0, kind: input, shape index: {}]   ;;  %s634_s1 = inlined_call_operand.hbm [shape: f32[8,256], index: 1, kind: output, shape index: {}]  }
   0x1   :  { %7 = vsyncpa [#allocation4], 0  ;;  %s13_s8 = sshll.u32 %s633_s0, 4  ;;  %s427_s9 = smov [#allocation2]   ;;  %s14_s8 = int_to_ptr.hbm [resolvable:$true] %s13_s8 }
   0x2   :  { %s15_s10 = sshll.u32 %s427_s9, 4  ;;  %s16_s10 = int_to_ptr.vmem [resolvable:$true] %s15_s10 }
   0x3   :  { %18 = dma.hbm_to_vmem [thread:$0]  %s14_s8, 256, %s16_s10, [#allocation3]  }
   0x4   :  { %423 = dma.done.wait [#allocation3], 256  }
   0x5   :  { %424 = vsyncadd [#allocation3], 4294967040  ;;  %v449_v0 = vld [vmem:[#allocation2] sm:$0xff]  ;;  %v451_v1 = vld [vmem:[#allocation2 + $0x8] sm:$0xff]  ;;  %v428_v25 = vmov 683565275  }
   0x6   :  { %v454_v2 = vmul.f32 10.0, %v449_v0  ;;  %v457_v3 = vmul.f32 10.0, %v451_v1  ;;  %v429_v27 = vmov 2475754826   ;;  %v430_v29 = vmov 2131351028  }
   0x7   :  { %v431_v31 = vmov 2102212464   ;;  %v432_v33 = vmov 920167782   ;;  %v433_v42 = vmov 1326507024  }
   0x8   :  { %v27_v4 = vand.u32 2147483647, %v454_v2  ;;  %v30_v5 = vand.u32 2139095040, %v454_v2  ;;  %v182_v6 = vand.u32 2147483647, %v457_v3  ;;  %v185_v7 = vand.u32 2139095040, %v457_v3 }
   0x9   :  { %s435_s0 = smov [#allocation5]   ;;  %s350_s14 = sshll.u32 %s634_s1, 4  ;;  %s351_s14 = int_to_ptr.hbm [resolvable:$true] %s350_s14 }
   0xa   :  { %v31_v8 = vshrl.u32 %v30_v5, 23  ;;  %v34_v9 = vand.u32 8388607, %v27_v4  ;;  %v186_v10 = vshrl.u32 %v185_v7, 23  ;;  %v189_v14 = vand.u32 8388607, %v182_v6 }
   0xb   :  { %s348_s11 = sshll.u32 %s435_s0, 4  ;;  %s349_s11 = int_to_ptr.vmem [resolvable:$true] %s348_s11 }
   0xc   :  { %v360_v11 = vadd.s32 4294967169, %v31_v8  ;;  %v35_v12 = vor.u32 8388608, %v34_v9  ;;  %v363_v13 = vadd.s32 4294967169, %v186_v10  ;;  %v190_v19 = vor.u32 8388608, %v189_v14 }
   0xe   :  { %v37_v15 = vadd.s32 1, %v360_v11  ;;  %v192_v16 = vadd.s32 1, %v363_v13  ;;  %v467_v18 = vshll.u32 %v35_v12, 8  ;;  %v477_v36 = vshll.u32 %v190_v19, 8 }
  0x10   :  { %vm38_vm0 = vcmp.gt.s32.totalorder %v37_v15, 0  ;;  %vm193_vm1 = vcmp.gt.s32.totalorder %v192_v16, 0  ;;  %v76_v35 = vand.u32 65535, %v467_v18  ;;  %v77_v40 = vshrl.u32 %v467_v18, 16 }
  0x11   :  { %v39_v17 = vsel %vm38_vm0, %v37_v15, 0  ;;  %v194_v21 = vsel %vm193_vm1, %v192_v16, 0 }
  0x12   :  { %v41_v20 = vand.u32 31, %v39_v17  ;;  %v469_v22 = vshrl.u32 %v39_v17, 5  ;;  %v471_v23 = vand.u32 31, %v194_v21  ;;  %v495_v53 = vshrl.u32 %v194_v21, 5 }
  0x14   :  { %v42_v24 = vsub.s32 32, %v41_v20  ;;  %v44_v26 = vshll.u32 %v428_v25, %v41_v20  ;;  %v47_v28 = vshll.u32 %v429_v27, %v41_v20  ;;  %v50_v30 = vshll.u32 %v430_v29, %v41_v20 }
  0x15   :  { %v53_v32 = vshll.u32 %v431_v31, %v41_v20  ;;  %v56_v34 = vshll.u32 %v432_v33, %v41_v20  ;;  %vm59_vm2 = vcmp.lt.s32.totalorder %v469_v22, 1  ;;  %vm62_vm3 = vcmp.lt.s32.totalorder %v469_v22, 4 }
  0x16   :  { %v45_v37 = vshrl.u32 %v429_v27, %v42_v24  ;;  %v48_v38 = vshrl.u32 %v430_v29, %v42_v24  ;;  %v51_v39 = vshrl.u32 %v431_v31, %v42_v24  ;;  %v54_v41 = vshrl.u32 %v432_v33, %v42_v24 }
  0x17   :  { %v57_v43 = vshrl.u32 %v433_v42, %v42_v24  ;;  %v486_v47 = vsub.s32 32, %v471_v23  ;;  %v43_v48 = vshrl.u32 %v428_v25, %v42_v24  ;;  %vm61_vm4 = vcmp.lt.s32.totalorder %v469_v22, 3 }
  0x18   :  { %v46_v44 = vor.u32 %v45_v37, %v44_v26  ;;  %v49_v45 = vor.u32 %v48_v38, %v47_v28  ;;  %v52_v46 = vor.u32 %v51_v39, %v50_v30  ;;  %v55_v49 = vor.u32 %v54_v41, %v53_v32 }
  0x19   :  { %v58_v50 = vor.u32 %v57_v43, %v56_v34  ;;  %vm60_vm5 = vcmp.lt.s32.totalorder %v469_v22, 2  ;;  %v199_v56 = vshll.u32 %v428_v25, %v471_v23  ;;  %v202_v57 = vshll.u32 %v429_v27, %v471_v23 }
  0x1a   :  { %v67_v51 = vsel %vm59_vm2, %v46_v44, %v49_v45  ;;  %v71_v52 = vsel %vm59_vm2, %v49_v45, %v52_v46  ;;  %v68_v54 = vsel %vm62_vm3, %v55_v49, 920167782  ;;  %v64_v58 = vsel %vm62_vm3, %v52_v46, 2102212464 }
  0x1b   :  { %v72_v55 = vsel %vm62_vm3, %v58_v50, 1326507024  ;;  %v69_v59 = vsel %vm61_vm4, %v52_v46, %v68_v54  ;;  %v200_v61 = vshrl.u32 %v429_v27, %v486_v47  ;;  %v63_v62 = vsel %vm59_vm2, %v43_v48, %v46_v44 }
  0x1c   :  { %v73_v60 = vsel %vm61_vm4, %v55_v49, %v72_v55  ;;  %v70_v63 = vsel %vm60_vm5, %v67_v51, %v69_v59  ;;  %v203_v7 = vshrl.u32 %v430_v29, %v486_v47  ;;  %v65_v12 = vsel %vm61_vm4, %v49_v45, %v64_v58 }
  0x1d   :  { %v74_v5 = vsel %vm60_vm5, %v71_v52, %v73_v60  ;;  %v100_v10 = vand.u32 65535, %v70_v63  ;;  %v101_v11 = vshrl.u32 %v70_v63, 16  ;;  %v520_v13 = vor.u32 %v200_v61, %v199_v56 }
  0x1e   :  { %v78_v8 = vand.u32 65535, %v74_v5  ;;  %v79_v9 = vshrl.u32 %v74_v5, 16  ;;  %v522_v14 = vor.u32 %v203_v7, %v202_v57  ;;  %v205_v15 = vshll.u32 %v430_v29, %v471_v23 }
  0x1f   :  { %v206_v20 = vshrl.u32 %v431_v31, %v486_v47  ;;  %v102_v24 = vmul.u32 %v100_v10, %v76_v35  ;;  %v103_v26 = vmul.u32 %v101_v11, %v76_v35  ;;  %v104_v27 = vmul.u32 %v100_v10, %v77_v40 }
  0x20   :  { %v80_v16 = vmul.u32 %v78_v8, %v76_v35  ;;  %v81_v17 = vmul.u32 %v79_v9, %v76_v35  ;;  %v82_v19 = vmul.u32 %v78_v8, %v77_v40  ;;  %v83_v21 = vmul.u32 %v79_v9, %v77_v40 }
  0x21   :  { %v105_v34 = vmul.u32 %v101_v11, %v77_v40  ;;  %v106_v38 = vshll.u32 %v103_v26, 16  ;;  %v107_v39 = vshrl.u32 %v103_v26, 16  ;;  %v108_v41 = vshll.u32 %v104_v27, 16 }
  0x22   :  { %v84_v28 = vshll.u32 %v81_v17, 16  ;;  %v85_v30 = vshrl.u32 %v81_v17, 16  ;;  %v86_v32 = vshll.u32 %v82_v19, 16  ;;  %v87_v37 = vshrl.u32 %v82_v19, 16 }
  0x23   :  { %v109_v43 = vshrl.u32 %v104_v27, 16  ;;  %v208_v44 = vshll.u32 %v431_v31, %v471_v23  ;;  %v434_v45 = vmov 0   ;;  %vm110_vm7 = vc.u32 %v102_v24, %v106_v38 }
  0x24   :  { %vm88_vm6 = vc.u32 %v80_v16, %v84_v28  ;;  %v90_v29 = vadd.s32 %v84_v28, %v80_v16  ;;  %v112_v35 = vadd.s32 %v106_v38, %v102_v24  ;;  %v209_v48 = vshrl.u32 %v432_v33, %v486_v47 }
  0x25   :  { %v89_v46 = vsel %vm88_vm6, 1, %v434_v45  ;;  %v111_v40 = vsel %vm110_vm7, 1, %v434_v45  ;;  %v211_v50 = vshll.u32 %v432_v33, %v471_v23  ;;  %v207_v31 = vor.u32 %v206_v20, %v205_v15 }
  0x26   :  { %v91_v49 = vadd.s32 %v89_v46, %v83_v21  ;;  %vm92_vm8 = vc.u32 %v90_v29, %v86_v32  ;;  %v113_v52 = vadd.s32 %v111_v40, %v105_v34  ;;  %vm114_vm9 = vc.u32 %v112_v35, %v108_v41 }
  0x27   :  { %v93_v51 = vsel %vm92_vm8, 1, %v434_v45  ;;  %v115_v55 = vsel %vm114_vm9, 1, %v434_v45  ;;  %v210_v56 = vor.u32 %v209_v48, %v208_v44  ;;  %v212_v57 = vshrl.u32 %v433_v42, %v486_v47 }
  0x28   :  { %v95_v54 = vadd.s32 %v93_v51, %v91_v49  ;;  %v539_v58 = vadd.s32 %v112_v35, %v108_v41  ;;  %v117_v59 = vadd.s32 %v115_v55, %v113_v52  ;;  %vm214_vm10 = vcmp.lt.s32.totalorder %v495_v53, 1 }
  0x29   :  { %vm216_vm11 = vcmp.lt.s32.totalorder %v495_v53, 3  ;;  %v213_v33 = vor.u32 %v212_v57, %v211_v50  ;;  %vm215_vm12 = vcmp.lt.s32.totalorder %v495_v53, 2  ;;  %vm217_vm13 = vcmp.lt.s32.totalorder %v495_v53, 4 }
  0x2a   :  { %v96_v23 = vadd.s32 %v95_v54, %v85_v30  ;;  %v66_v60 = vsel %vm60_vm5, %v63_v62, %v65_v12  ;;  %v118_v61 = vadd.s32 %v117_v59, %v107_v39  ;;  %v222_v42 = vsel %vm214_vm10, %v520_v13, %v522_v14 }
  0x2b   :  { %v223_v63 = vsel %vm217_vm13, %v210_v56, 920167782  ;;  %v226_v8 = vsel %vm214_vm10, %v522_v14, %v207_v31  ;;  %v231_v22 = vand.u32 65535, %v477_v36  ;;  %v227_v10 = vsel %vm217_vm13, %v213_v33, 1326507024 }
  0x2c   :  { %v553_v5 = vadd.s32 %v96_v23, %v87_v37  ;;  %v224_v7 = vsel %vm216_vm11, %v207_v31, %v223_v63  ;;  %v119_v62 = vadd.s32 %v118_v61, %v109_v43  ;;  %v232_v11 = vshrl.u32 %v477_v36, 16 }
  0x2d   :  { %v225_v9 = vsel %vm215_vm12, %v222_v42, %v224_v7  ;;  %v120_v12 = vmul.u32 %v467_v18, %v66_v60  ;;  %v228_v15 = vsel %vm216_vm11, %v210_v56, %v227_v10  ;;  %v198_v27 = vshrl.u32 %v428_v25, %v486_v47 }
  0x2e   :  { %vm122_vm14 = vc.u32 %v553_v5, %v539_v58  ;;  %v255_v16 = vand.u32 65535, %v225_v9  ;;  %v123_v17 = vadd.s32 1, %v119_v62  ;;  %v229_v19 = vsel %vm215_vm12, %v226_v8, %v228_v15 }
  0x2f   :  { %v256_v20 = vshrl.u32 %v225_v9, 16  ;;  %v233_v21 = vand.u32 65535, %v229_v19  ;;  %v234_v24 = vshrl.u32 %v229_v19, 16  ;;  %v219_v29 = vsel %vm217_vm13, %v207_v31, 2102212464 }
  0x30   :  { %v124_v26 = vsel %vm122_vm14, %v123_v17, %v119_v62  ;;  %v259_v18 = vmul.u32 %v255_v16, %v232_v11  ;;  %v257_v37 = vmul.u32 %v255_v16, %v231_v22  ;;  %v218_v46 = vsel %vm214_vm10, %v198_v27, %v520_v13 }
  0x31   :  { %v258_v28 = vmul.u32 %v256_v20, %v231_v22  ;;  %v125_v30 = vadd.s32 %v124_v26, %v120_v12  ;;  %v235_v32 = vmul.u32 %v233_v21, %v231_v22  ;;  %v236_v34 = vmul.u32 %v234_v24, %v231_v22 }
  0x32   :  { %v237_v38 = vmul.u32 %v233_v21, %v232_v11  ;;  %v238_v43 = vmul.u32 %v234_v24, %v232_v11  ;;  %v260_v25 = vmul.u32 %v256_v20, %v232_v11  ;;  %v263_v47 = vshll.u32 %v259_v18, 16 }
  0x33   :  { %v261_v39 = vshll.u32 %v258_v28, 16  ;;  %v126_v41 = vadd.s32 536870912, %v125_v30  ;;  %v239_v44 = vshll.u32 %v236_v34, 16  ;;  %v220_v40 = vsel %vm216_vm11, %v522_v14, %v219_v29 }
  0x34   :  { %v241_v35 = vshll.u32 %v237_v38, 16  ;;  %v240_v13 = vshrl.u32 %v236_v34, 16  ;;  %v262_v56 = vshrl.u32 %v258_v28, 16  ;;  %v242_v23 = vshrl.u32 %v237_v38, 16 }
  0x35   :  { %v580_v48 = vshrl.u32 %v126_v41, 30  ;;  %vm243_vm15 = vc.u32 %v235_v32, %v239_v44  ;;  %v245_v49 = vadd.s32 %v239_v44, %v235_v32  ;;  %vm265_vm0 = vc.u32 %v257_v37, %v261_v39 }
  0x36   :  { %v244_v50 = vsel %vm243_vm15, 1, %v434_v45  ;;  %v266_v51 = vsel %vm265_vm0, 1, %v434_v45  ;;  %v267_v52 = vadd.s32 %v261_v39, %v257_v37  ;;  %v264_v60 = vshrl.u32 %v259_v18, 16 }
  0x37   :  { %v128_v31 = vshll.u32 %v580_v48, 30  ;;  %v246_v54 = vadd.s32 %v244_v50, %v238_v43  ;;  %vm247_vm1 = vc.u32 %v245_v49, %v241_v35  ;;  %v268_v57 = vadd.s32 %v266_v51, %v260_v25 }
  0x38   :  { %v248_v55 = vsel %vm247_vm1, 1, %v434_v45  ;;  %vm269_vm2 = vc.u32 %v267_v52, %v263_v47  ;;  %v271_v7 = vadd.s32 %v267_v52, %v263_v47  ;;  %v221_v8 = vsel %vm215_vm12, %v218_v46, %v220_v40 }
  0x39   :  { %v129_v59 = vsub.s32 %v125_v30, %v128_v31  ;;  %v250_v33 = vadd.s32 %v248_v55, %v246_v54  ;;  %v270_v14 = vsel %vm269_vm2, 1, %v434_v45  ;;  %v275_v12 = vmul.u32 %v477_v36, %v221_v8 }
  0x3a   :  { %v272_v61 = vadd.s32 %v270_v14, %v268_v57  ;;  %v121_v45 = vadd.s32 %v539_v58, %v553_v5  ;;  %v151_v41 = vsub.s32 4, %v580_v48  ;;  %vm29_vm7 = vcmp.lt.s32.totalorder %v454_v2, 0 }
  0x3b   :  { %vm130_vm3 = vcmp.lt.s32.totalorder %v129_v59, 0  ;;  %v131_v42 = vsub.s32 0, %v129_v59  ;;  %v251_v63 = vadd.s32 %v250_v33, %v240_v13  ;;  %vm602_vm8 = vcmp.le.f32.partialorder %v27_v4, 0.7853982 }
  0x3c   :  { %v273_v22 = vadd.s32 %v272_v61, %v262_v56  ;;  %v152_v25 = vsel %vm29_vm7, %v151_v41, %v580_v48  ;;  %vm184_vm11 = vcmp.lt.s32.totalorder %v457_v3, 0  ;;  %vm616_vm13 = vcmp.le.f32.partialorder %v182_v6, 0.7853982 }
  0x3d   :  { %v132_v62 = vsel %vm130_vm3, %v131_v42, %v129_v59  ;;  %v252_v9 = vadd.s32 %v251_v63, %v242_v23  ;;  %v154_v51 = vsel %vm602_vm8, 0, %v152_v25  ;;  %vm170_vm15 = vweird.f32 %v454_v2 }
  0x3e   :  { %v133_v10 = vclz %v132_v62  ;;  %v274_v11 = vadd.s32 %v273_v22, %v264_v60  ;;  %vm325_vm3 = vweird.f32 %v457_v3 }
  0x3f   :  { %vm277_vm4 = vc.u32 %v252_v9, %v271_v7  ;;  %v276_v50 = vadd.s32 %v271_v7, %v252_v9 }
  0x40   :  { %v361_v15 = vadd.s32 4294967294, %v133_v10  ;;  %v278_v16 = vadd.s32 1, %v274_v11 }
  0x42   :  { %vm362_vm5 = vcmp.lt.s32.totalorder %v361_v15, 0  ;;  %v279_v17 = vsel %vm277_vm4, %v278_v16, %v274_v11 }
  0x43   :  { %v136_v19 = vsel %vm362_vm5, 0, %v361_v15  ;;  %v280_v20 = vadd.s32 %v279_v17, %v275_v12 }
  0x44   :  { %v137_v21 = vsub.s32 32, %v136_v19  ;;  %v138_v53 = vshll.u32 %v129_v59, %v136_v19  ;;  %v141_v24 = vsub.s32 4294967266, %v136_v19  ;;  %v171_v59 = vadd.s32 3, %v154_v51 }
  0x45   :  { %v281_v26 = vadd.s32 536870912, %v280_v20 }
  0x46   :  { %v139_v27 = vshrl.u32 %v121_v45, %v137_v21  ;;  %v142_v28 = vadd.s32 127, %v141_v24  ;;  %v172_v7 = vand.u32 3, %v171_v59 }
  0x47   :  { %v595_v18 = vshrl.u32 %v281_v26, 30 }
  0x48   :  { %v140_v30 = vor.u32 %v139_v27, %v138_v53  ;;  %v143_v36 = vshll.u32 %v142_v28, 23  ;;  %vm177_vm10 = vcmp.eq.s32.totalorder %v172_v7, 2  ;;  %vm174_vm12 = vcmp.eq.s32.totalorder %v172_v7, 0 }
  0x49   :  { %v283_v32 = vshll.u32 %v595_v18, 30  ;;  %v306_v16 = vsub.s32 4, %v595_v18  ;;  %vm173_vm14 = vcmp.lt.s32.totalorder %v172_v7, 2 }
  0x4a   :  { %v144_v34 = vor.u32 4788187, %v143_v36  ;;  %v147_v37 = vcvt.s32.f32 %v140_v30 }
  0x4b   :  { %v284_v38 = vsub.s32 %v280_v20, %v283_v32  ;;  %v307_v26 = vsel %vm184_vm11, %v306_v16, %v595_v18 }
  0x4c   :  { %v145_v58 = vand.u32 2147483647, %v144_v34  ;;  %v309_v32 = vsel %vm616_vm13, 0, %v307_v26 }
  0x4d   :  { %vm285_vm6 = vcmp.lt.s32.totalorder %v284_v38, 0  ;;  %v286_v5 = vsub.s32 0, %v284_v38 }
  0x4e   :  { %v148_v39 = vmul.f32 %v147_v37, %v145_v58 }
  0x4f   :  { %v287_v29 = vsel %vm285_vm6, %v286_v5, %v284_v38 }
  0x50   :  { %v149_v44 = vxor.u32 2147483648, %v148_v39  ;;  %v288_v46 = vclz %v287_v29 }
  0x52   :  { %v150_v35 = vsel %vm29_vm7, %v149_v44, %v148_v39  ;;  %v364_v47 = vadd.s32 4294967294, %v288_v46  ;;  %v326_v39 = vadd.s32 3, %v309_v32 }
  0x53   :  { %v153_v49 = vsel %vm602_vm8, %v454_v2, %v150_v35 }
  0x54   :  { %v155_v40 = vmul.f32 %v153_v49, %v153_v49  ;;  %vm365_vm9 = vcmp.lt.s32.totalorder %v364_v47, 0  ;;  %v327_v44 = vand.u32 3, %v326_v39 }
  0x55   :  { %v291_v4 = vsel %vm365_vm9, 0, %v364_v47 }
  0x56   :  { %v156_v52 = vmul.f32 -0.001358992, %v155_v40  ;;  %v163_v31 = vmul.f32 -0.00019511016, %v155_v40  ;;  %v292_v13 = vsub.s32 32, %v291_v4  ;;  %v293_v54 = vshll.u32 %v284_v38, %v291_v4 }
  0x57   :  { %v296_v55 = vsub.s32 4294967266, %v291_v4  ;;  %vm332_vm0 = vcmp.eq.s32.totalorder %v327_v44, 2  ;;  %vm329_vm1 = vcmp.eq.s32.totalorder %v327_v44, 0  ;;  %vm328_vm2 = vcmp.lt.s32.totalorder %v327_v44, 2 }
  0x58   :  { %v157_v56 = vadd.f32 0.041655596, %v156_v52  ;;  %v164_v57 = vadd.f32 0.008332121, %v163_v31  ;;  %v294_v48 = vshrl.u32 %v276_v50, %v292_v13 }
  0x59   :  { %v297_v23 = vadd.s32 127, %v296_v55 }
  0x5a   :  { %v158_v33 = vmul.f32 %v157_v56, %v155_v40  ;;  %v165_v14 = vmul.f32 %v164_v57, %v155_v40  ;;  %v295_v60 = vor.u32 %v294_v48, %v293_v54 }
  0x5b   :  { %v298_v61 = vshll.u32 %v297_v23, 23 }
  0x5c   :  { %v159_v42 = vadd.f32 -0.4999988, %v158_v33  ;;  %v166_v63 = vadd.f32 -0.16666654, %v165_v14  ;;  %v302_v22 = vcvt.s32.f32 %v295_v60 }
  0x5d   :  { %v299_v8 = vor.u32 4788187, %v298_v61 }
  0x5e   :  { %v160_v62 = vmul.f32 %v159_v42, %v155_v40  ;;  %v167_v9 = vmul.f32 %v166_v63, %v155_v40 }
  0x5f   :  { %v300_v10 = vand.u32 2147483647, %v299_v8 }
  0x60   :  { %v161_v11 = vadd.f32 1.0, %v160_v62  ;;  %v168_v12 = vadd.f32 1.0, %v167_v9 }
  0x61   :  { %v303_v15 = vmul.f32 %v302_v22, %v300_v10 }
  0x62   :  { %v169_v45 = vmul.f32 %v168_v12, %v153_v49  ;;  %v178_v17 = vxor.u32 2147483648, %v161_v11 }
  0x63   :  { %v304_v20 = vxor.u32 2147483648, %v303_v15 }
  0x64   :  { %v175_v21 = vxor.u32 2147483648, %v169_v45  ;;  %v179_v53 = vsel %vm177_vm10, %v178_v17, %v169_v45 }
  0x65   :  { %v305_v24 = vsel %vm184_vm11, %v304_v20, %v303_v15 }
  0x66   :  { %v176_v27 = vsel %vm174_vm12, %v161_v11, %v175_v21  ;;  %v308_v28 = vsel %vm616_vm13, %v457_v3, %v305_v24 }
  0x67   :  { %v180_v30 = vsel %vm173_vm14, %v176_v27, %v179_v53  ;;  %v310_v36 = vmul.f32 %v308_v28, %v308_v28 }
  0x68   :  { %v181_v6 = vsel %vm170_vm15, nan, %v180_v30 }
  0x69   :  { %v311_v34 = vmul.f32 -0.001358992, %v310_v36  ;;  %v318_v37 = vmul.f32 -0.00019511016, %v310_v36  ;;  %v337_v38 = vmul.f32 0.2, %v181_v6 }
  0x6b   :  { %v312_v58 = vadd.f32 0.041655596, %v311_v34  ;;  %v319_v5 = vadd.f32 0.008332121, %v318_v37  ;;  %v339_v2 = vadd.f32 %v337_v38, %v449_v0 }
  0x6d   :  { %v313_v18 = vmul.f32 %v312_v58, %v310_v36  ;;  %v320_v41 = vmul.f32 %v319_v5, %v310_v36  ;;  %341 = vst [vmem:[#allocation5] sm:$0xff] %v339_v2 }
  0x6f   :  { %v314_v29 = vadd.f32 -0.4999988, %v313_v18  ;;  %v321_v43 = vadd.f32 -0.16666654, %v320_v41 }
  0x71   :  { %v315_v46 = vmul.f32 %v314_v29, %v310_v36  ;;  %v322_v35 = vmul.f32 %v321_v43, %v310_v36 }
  0x73   :  { %v316_v25 = vadd.f32 1.0, %v315_v46  ;;  %v323_v47 = vadd.f32 1.0, %v322_v35 }
  0x75   :  { %v324_v49 = vmul.f32 %v323_v47, %v308_v28  ;;  %v333_v40 = vxor.u32 2147483648, %v316_v25 }
  0x77   :  { %v330_v50 = vxor.u32 2147483648, %v324_v49  ;;  %v334_v51 = vsel %vm332_vm0, %v333_v40, %v324_v49 }
  0x79   :  { %v331_v0 = vsel %vm329_vm1, %v316_v25, %v330_v50 }
  0x7a   :  { %v335_v4 = vsel %vm328_vm2, %v331_v0, %v334_v51 }
  0x7b   :  { %v336_v52 = vsel %vm325_vm3, nan, %v335_v4 }
  0x7c   :  { %v338_v31 = vmul.f32 0.2, %v336_v52 }
  0x7e   :  { %v340_v13 = vadd.f32 %v338_v31, %v451_v1 }
  0x80   :  { %342 = vst [vmem:[#allocation5 + $0x8] sm:$0xff] %v340_v13 }
  0x81   :  { %353 = dma.vmem_to_hbm [thread:$0]  %s349_s11, 256, %s351_s14, [#allocation4]  }
  0x82   :  { %425 = dma.done.wait [#allocation4], 256  }
  0x83   :  { %426 = vsyncadd [#allocation4], 4294967040 }
  0x84   :  { %358 = vsyncpa [#allocation3], 1 }
  0x85   :  { %359 = vsyncpa [#allocation4], 1 }

</bundles_post_ra>
